<compile_context>
chip_gen: v7x
topology: tpu7x:2x2x1
jax: 0.10.0
libtpu: 0.0.40
codegen_flags: <defaults>
</compile_context>

<pallas_src>
import functools

import jax
import jax.numpy as jnp
from jax import lax
from jax.experimental import pallas as pl
from jax.experimental.pallas import tpu as pltpu


def _default_lane():
    """256-wide intra tiles on v6e/v7x (native 256x256 MXU), 128 elsewhere."""
    try:
        kind = jax.devices()[0].device_kind.lower()
    except Exception:
        return 128
    return 256 if ("v6" in kind or "v7" in kind) else 128


def _cox_loss_kernel(risk_ref, censor_ref, out_ref, *, inv_n, lane):
    # risk_ref / censor_ref : (R, lane) f32, row-major flattening of the
    #                         descending-time-sorted (and padded) vectors.
    r = risk_ref[...]                              # (R, L)
    c = censor_ref[...]                            # (R, L)
    rows = r.shape[0]

    # Numerical stabilization: subtract the global max (matches PyTorch module).
    r = r - jnp.max(r)
    e = jnp.exp(r)                                 # padded lanes: exp(-huge) = 0

    # In-kernel upper-triangular (incl. diagonal) mask: tri[j, i] = 1 iff j <= i.
    jj = lax.broadcasted_iota(jnp.int32, (lane, lane), 0)
    ii = lax.broadcasted_iota(jnp.int32, (lane, lane), 1)
    tri = (jj <= ii).astype(jnp.float32)

    # Intra-row inclusive prefix sums on the MXU (full-f32 accumulation):
    #   intra[row, i] = sum_{j <= i} e[row, j]
    intra = jnp.dot(e, tri,
                    precision=lax.Precision.HIGHEST,
                    preferred_element_type=jnp.float32)       # (R, L)

    # Cross-row exclusive prefix.  The full row sums already sit in the last
    # column of `intra`; scan them with a tiny strict-lower-triangular dot.
    row_tot = intra[:, lane - 1:lane]              # (R, 1): total of each row
    rr = lax.broadcasted_iota(jnp.int32, (rows, rows), 0)
    pp = lax.broadcasted_iota(jnp.int32, (rows, rows), 1)
    lower = (pp < rr).astype(jnp.float32)          # strict lower tri (p < r)
    offs = jnp.dot(lower, row_tot,
                   precision=lax.Precision.HIGHEST,
                   preferred_element_type=jnp.float32)        # (R, 1)

    cum = intra + offs                             # running cumsum of exp(r)

    term = r - jnp.log(cum + 1e-15)
    loss = -term * c                               # padded lanes: finite * 0 = 0

    # torch .mean() divides by the real N (all samples, censored or not).
    out_ref[0] = jnp.sum(loss) * inv_n


def cox_loss(log_risks, times, censor, lane=None):
    """Pallas implementation of CoxLoss.forward(log_risks, times, censor)."""
    if lane is None:
        lane = _default_lane()
    log_risks = jnp.asarray(log_risks, jnp.float32).reshape(-1)
    times = jnp.asarray(times).reshape(-1)
    censor = jnp.asarray(censor, jnp.float32).reshape(-1)
    n = log_risks.shape[0]

    # torch.sort(times, descending=True) -> indices; gather is plain-JAX glue.
    order = jnp.argsort(-times)
    sorted_risks = log_risks[order]
    sorted_censor = censor[order]

    # Pack into a sublane-dense (rows, lane) tile, rows a multiple of 8.
    rows = -(-n // lane)
    rows = max(8, -(-rows // 8) * 8)
    n_pad = rows * lane - n
    # Pad risks with -1e30 (-> exp = 0, no cumsum perturbation) and censor with
    # 0 (multiplied last, so padded lanes contribute exactly 0 to the loss).
    sorted_risks = jnp.pad(sorted_risks, (0, n_pad),
                           constant_values=-1e30).reshape(rows, lane)
    sorted_censor = jnp.pad(sorted_censor, (0, n_pad),
                            constant_values=0.0).reshape(rows, lane)

    kernel = functools.partial(_cox_loss_kernel, inv_n=1.0 / float(n), lane=lane)

    out = pl.pallas_call(
        kernel,
        in_specs=[
            pl.BlockSpec(memory_space=pltpu.MemorySpace.VMEM),
            pl.BlockSpec(memory_space=pltpu.MemorySpace.VMEM),
        ],
        out_specs=pl.BlockSpec(memory_space=pltpu.MemorySpace.SMEM),
        out_shape=jax.ShapeDtypeStruct((1,), jnp.float32),
    )(sorted_risks, sorted_censor)
    return out[0]


if __name__ == "__main__":
    key = jax.random.PRNGKey(0)
    jitted = jax.jit(cox_loss, static_argnames=("lane",))

    # (n, lane): 200 @ 128 exercises the multi-row (cross-block offset) path;
    # 200 @ 256 exercises the wide-tile (v6e/v7x-style) path.
    for n, lane in ((8, 128), (200, 128), (200, 256)):
        k1, k2, k3 = jax.random.split(jax.random.fold_in(key, n * 1000 + lane), 3)
        log_risks = jax.random.normal(k1, (n,), dtype=jnp.float32)          # NN predictions
        times = jax.random.uniform(k2, (n,), dtype=jnp.float32,
                                   minval=0.0, maxval=10.0)                  # survival times
        censor = (jax.random.uniform(k3, (n,)) > 0.5).astype(jnp.float32)    # event indicators

        loss = jitted(log_risks, times, censor, lane=lane)
        jax.block_until_ready(loss)

        # pure-JAX reference of the same math (sanity check)
        order = jnp.argsort(-times)
        sr = log_risks[order]
        sr = sr - jnp.max(sr)
        ref = jnp.mean(-(sr - jnp.log(jnp.cumsum(jnp.exp(sr)) + 1e-15)) * censor[order])
        assert jnp.allclose(loss, ref, atol=1e-5, rtol=1e-5), (n, lane, loss, ref)

    print("KERNEL_OK")
</pallas_src>

<mosaic_0001>
module attributes {stable_mosaic.version = 11 : i64} {
  func.func @_cox_loss_kernel(%arg0: memref<8x128xf32, #tpu.memory_space<vmem>>, %arg1: memref<8x128xf32, #tpu.memory_space<vmem>>, %arg2: memref<1xf32, #tpu.memory_space<smem>>) attributes {dimension_semantics = [], scalar_prefetch = 0 : i64, scratch_operands = 0 : i64, tpu.core_type = #tpu.core_type<tc>} {
    %c0 = arith.constant 0 : index
    %c0_0 = arith.constant 0 : index
    %0 = vector.load %arg0[%c0, %c0_0] : memref<8x128xf32, #tpu.memory_space<vmem>>, vector<8x128xf32>
    %c0_1 = arith.constant 0 : index
    %c0_2 = arith.constant 0 : index
    %1 = vector.load %arg1[%c0_1, %c0_2] : memref<8x128xf32, #tpu.memory_space<vmem>>, vector<8x128xf32>
    %2 = vector.shape_cast %0 : vector<8x128xf32> to vector<1x8x128xf32>
    %cst = arith.constant dense<0xFF800000> : vector<1xf32>
    %3 = vector.multi_reduction <maximumf>, %2, %cst [1, 2] : vector<1x8x128xf32> to vector<1xf32>
    %4 = vector.shape_cast %3 : vector<1xf32> to vector<1x1x1xf32>
    %5 = vector.extract %4[0, 0, 0] : f32 from vector<1x1x1xf32>
    %6 = vector.broadcast %5 : f32 to vector<8x128xf32>
    %7 = arith.subf %0, %6 : vector<8x128xf32>
    %8 = math.exp %7 : vector<8x128xf32>
    %9 = tpu.iota {dimensions = array<i32: 0>} : vector<128x128xi32>
    %10 = tpu.iota {dimensions = array<i32: 1>} : vector<128x128xi32>
    %11 = arith.cmpi sle, %9, %10 : vector<128x128xi32>
    %12 = arith.extui %11 : vector<128x128xi1> to vector<128x128xi32>
    %13 = arith.sitofp %12 : vector<128x128xi32> to vector<128x128xf32>
    %cst_3 = arith.constant dense<0.000000e+00> : vector<8x128xf32>
    %14 = tpu.matmul %8, %13, %cst_3 {dimension_numbers = #tpu.dot_dimension_numbers<[1], [0], [0], [1], [0, 0, 1, 1], [], []>, precision = #tpu.contract_precision<fp32>} : vector<8x128xf32>, vector<128x128xf32>, vector<8x128xf32> -> vector<8x128xf32>
    %15 = vector.extract_strided_slice %14 {offsets = [0, 127], sizes = [8, 1], strides = [1, 1]} : vector<8x128xf32> to vector<8x1xf32>
    %16 = tpu.iota {dimensions = array<i32: 0>} : vector<8x8xi32>
    %17 = tpu.iota {dimensions = array<i32: 1>} : vector<8x8xi32>
    %18 = arith.cmpi slt, %17, %16 : vector<8x8xi32>
    %19 = arith.extui %18 : vector<8x8xi1> to vector<8x8xi32>
    %20 = arith.sitofp %19 : vector<8x8xi32> to vector<8x8xf32>
    %cst_4 = arith.constant dense<0.000000e+00> : vector<8x1xf32>
    %21 = tpu.matmul %20, %15, %cst_4 {dimension_numbers = #tpu.dot_dimension_numbers<[1], [0], [0], [1], [0, 0, 1, 1], [], []>, precision = #tpu.contract_precision<fp32>} : vector<8x8xf32>, vector<8x1xf32>, vector<8x1xf32> -> vector<8x1xf32>
    %22 = vector.broadcast %21 : vector<8x1xf32> to vector<8x128xf32>
    %23 = arith.addf %14, %22 : vector<8x128xf32>
    %cst_5 = arith.constant 1.000000e-15 : f32
    %24 = vector.broadcast %cst_5 : f32 to vector<8x128xf32>
    %25 = arith.addf %23, %24 : vector<8x128xf32>
    %26 = math.log %25 : vector<8x128xf32>
    %27 = arith.subf %7, %26 : vector<8x128xf32>
    %cst_6 = arith.constant 0.000000e+00 : f32
    %28 = vector.broadcast %cst_6 : f32 to vector<8x128xf32>
    %29 = arith.subf %28, %27 : vector<8x128xf32>
    %30 = arith.mulf %29, %1 : vector<8x128xf32>
    %31 = vector.shape_cast %30 : vector<8x128xf32> to vector<1x8x128xf32>
    %cst_7 = arith.constant dense<0.000000e+00> : vector<1xf32>
    %32 = vector.multi_reduction <add>, %31, %cst_7 [1, 2] : vector<1x8x128xf32> to vector<1xf32>
    %33 = vector.shape_cast %32 : vector<1xf32> to vector<1x1x1xf32>
    %34 = vector.extract %33[0, 0, 0] : f32 from vector<1x1x1xf32>
    %cst_8 = arith.constant 1.250000e-01 : f32
    %35 = arith.mulf %34, %cst_8 : f32
    %c0_9 = arith.constant 0 : index
    %36 = memref.load %arg2[%c0_9] : memref<1xf32, #tpu.memory_space<smem>>
    memref.store %35, %arg2[%c0_9] : memref<1xf32, #tpu.memory_space<smem>>
    return
  }
}

</mosaic_0001>

<bundles_post_ra>
// kernel: neg.1
= control target key start
LH: loop header
LB: loop body
LE: loop exit
PB: predicated region body
PF: predicated region fallthrough
CT: control target
= control target key end

     0   :  { %s24_s0 = inlined_call_operand.vmem [shape: f32[8], index: 0, kind: input, shape index: {}]   ;;  %s25_s1 = inlined_call_operand.vmem [shape: f32[8], index: 1, kind: output, shape index: {}]  }
   0x1   :  { %v2_v0 = vld [vmem:[%s24_s0] sm:$0x1] }
   0x2   :  { %v5_v1 = vxor.u32 2147483648, %v2_v0 }
   0x4   :  { %7 = vst [vmem:[%s25_s1] sm:$0x1] %v5_v1 }

// kernel: cox_loss.1
= control target key start
LH: loop header
LB: loop body
LE: loop exit
PB: predicated region body
PF: predicated region fallthrough
CT: control target
= control target key end

     0   :  { %s2427_s0 = inlined_call_operand.vmem [shape: f32[8,128], index: 0, kind: input, shape index: {}]   ;;  %s2428_s1 = inlined_call_operand.vmem [shape: f32[8,128], index: 1, kind: input, shape index: {}]   ;;  %s2429_s2 = inlined_call_operand.hbm [shape: f32[1], index: 2, kind: output, shape index: {}]  }
   0x1   :  { %v1867_v0 = vld [vmem:[%s2427_s0] sm:$0xff] }
   0x2   :  { %7 = vsyncpa [#allocation3], 0  ;;  %14 = vmax.xlane.f32.xlu0 %v1867_v0  ;;  %v27_v1 = vlaneseq  ;;  %v1842_v2 = vmov 0.0|0.0   ;;  %v1843_v11 = vmov 1.0|1.0   ;;  %v1844_v20 = vmov 0.0  }
   0x3   :  { %1723 = vmatprep.subr.bf16.mxu0 %v1842_v2  ;;  %1651 = vmatprep.subr.bf16.mxu1 %v1842_v2  ;;  %s1846_s11 = smov 1   ;;  %s1830_s18 = scalar_lea.hbm %s2429_s2, 16 }
   0x4   :  { %v1872_v3 = vshrl.u32 %v27_v1, 7  ;;  %v1874_v4 = vand.u32 127, %v27_v1  ;;  %p1831_p0 = scmp.ne.s32.totalorder %s2429_s2, %s1830_s18  ;;  %p1834_p1 = scmp.lt.u32.totalorder %s1830_s18, %s2429_s2 }
   0x6   :  { %v29_v5 = vadd.s32 8, %v1872_v3  ;;  %vm46_vm0 = vcmp.le.s32.totalorder %v1872_v3, %v1874_v4  ;;  %v1880_v6 = vadd.s32 16, %v1872_v3  ;;  %v1883_v7 = vadd.s32 24, %v1872_v3  ;;  %p1836_p2 = pnand %p1834_p1, %p1831_p0 }
   0x7   :  { %v1886_v8 = vadd.s32 32, %v1872_v3  ;;  %v1894_v9 = vadd.s32 40, %v1872_v3  ;;  %v1954_v14 = vadd.s32 48, %v1872_v3  ;;  %v1957_v15 = vadd.s32 56, %v1872_v3 }
   0x8   :  { %vm47_vm1 = vcmp.le.s32.totalorder %v29_v5, %v1874_v4  ;;  %vm48_vm2 = vcmp.le.s32.totalorder %v1880_v6, %v1874_v4  ;;  %vm49_vm3 = vcmp.le.s32.totalorder %v1883_v7, %v1874_v4  ;;  %v1980_v17 = vadd.s32 64, %v1872_v3 }
   0x9   :  { %vm1901_vm4 = vmpackc.low %vm47_vm1, %vm46_vm0  ;;  %vm50_vm6 = vcmp.le.s32.totalorder %v1886_v8, %v1874_v4  ;;  %vm51_vm7 = vcmp.le.s32.totalorder %v1894_v9, %v1874_v4  ;;  %vm52_vm9 = vcmp.le.s32.totalorder %v1954_v14, %v1874_v4  ;;  %vm53_vm10 = vcmp.le.s32.totalorder %v1957_v15, %v1874_v4 }
   0xa   :  { %1725 = vmatpush3.bf16.msk.msra.mxu0 %vm1901_vm4, %v1843_v11  ;;  %1653 = vmatpush3.bf16.msk.msra.mxu1 %vm1901_vm4, %v1843_v11  ;;  %vm1918_vm5 = vmpackc.low %vm49_vm3, %vm48_vm2  ;;  %v1983_v18 = vadd.s32 72, %v1872_v3  ;;  %vm54_vm12 = vcmp.le.s32.totalorder %v1980_v17, %v1874_v4  ;;  %v1229_v21 = vsel %vm46_vm0, 1.0, %v1844_v20  ;;  %v1230_v22 = vsel %vm47_vm1, 1.0, %v1844_v20 }
   0xb   :  { %1726 = vmatprep.subr.bf16.mxu0 %v1842_v2  ;;  %1654 = vmatprep.subr.bf16.mxu1 %v1842_v2  ;;  %vm1940_vm8 = vmpackc.low %vm51_vm7, %vm50_vm6  ;;  %v2015_v23 = vadd.s32 80, %v1872_v3  ;;  %v2018_v24 = vadd.s32 88, %v1872_v3  ;;  %v2026_v25 = vsub.f32 %v1229_v21, %v1229_v21  ;;  %v2028_v26 = vsub.f32 %v1230_v22, %v1230_v22 }
   0xc   :  { %vm1969_vm11 = vmpackc.low %vm53_vm10, %vm52_vm9  ;;  %vm2432_vm13 = vcmp.le.s32.totalorder %v1983_v18, %v1874_v4  ;;  %v2047_v28 = vadd.s32 96, %v1872_v3  ;;  %v2050_v29 = vadd.s32 104, %v1872_v3  ;;  %v1231_v33 = vsel %vm48_vm2, 1.0, %v1844_v20 }
   0xd   :  { %vm1997_vm14 = vmpackc.low %vm2432_vm13, %vm54_vm12  ;;  %vm2431_vm15 = vcmp.le.s32.totalorder %v2015_v23, %v1874_v4  ;;  %vm2430_vm0 = vcmp.le.s32.totalorder %v2018_v24, %v1874_v4  ;;  %v188_v30 = vand.u32 4294901760, %v2026_v25  ;;  %v195_v31 = vand.u32 4294901760, %v2028_v26 }
   0xe   :  { %1728 = vmatpush3.bf16.msk.msra.mxu0 %vm1918_vm5, %v1843_v11  ;;  %1656 = vmatpush3.bf16.msk.msra.mxu1 %vm1918_vm5, %v1843_v11  ;;  %vm2036_vm1 = vmpackc.low %vm2430_vm0, %vm2431_vm15  ;;  %vm58_vm0 = vcmp.le.s32.totalorder %v2047_v28, %v1874_v4  ;;  %vm59_vm15 = vcmp.le.s32.totalorder %v2050_v29, %v1874_v4  ;;  %v1232_v34 = vsel %vm49_vm3, 1.0, %v1844_v20  ;;  %v2087_v35 = vadd.s32 112, %v1872_v3 }
   0xf   :  { %1729 = vmatprep.subr.bf16.mxu0 %v1842_v2  ;;  %1657 = vmatprep.subr.bf16.mxu1 %v1842_v2  ;;  %vm2066_vm13 = vmpackc.low %vm59_vm15, %vm58_vm0  ;;  %v2090_v36 = vadd.s32 120, %v1872_v3  ;;  %v189_v37 = vsub.f32 %v2026_v25, %v188_v30  ;;  %v196_v38 = vsub.f32 %v2028_v26, %v195_v31  ;;  %v2094_v39 = vsub.f32 %v1231_v33, %v1231_v33 }
  0x10   :  { %v2096_v40 = vsub.f32 %v1232_v34, %v1232_v34  ;;  %v1233_v41 = vsel %vm50_vm6, 1.0, %v1844_v20  ;;  %v1234_v42 = vsel %vm51_vm7, 1.0, %v1844_v20  ;;  %vm60_vm2 = vcmp.le.s32.totalorder %v2087_v35, %v1874_v4 }
  0x11   :  { %vm61_vm3 = vcmp.le.s32.totalorder %v2090_v36, %v1874_v4  ;;  %v2110_v43 = vpack.c.bf16 %v195_v31, %v188_v30  ;;  %v190_v44 = vand.u32 4294901760, %v189_v37  ;;  %v197_v45 = vand.u32 4294901760, %v196_v38 }
  0x12   :  { %1731 = vmatpush3.bf16.msk.msra.mxu0 %vm1940_vm8, %v1843_v11  ;;  %1659 = vmatpush3.bf16.msk.msra.mxu1 %vm1940_vm8, %v1843_v11  ;;  %vm2118_vm6 = vmpackc.low %vm61_vm3, %vm60_vm2  ;;  %vm1845_vm7 = vmmov 0   ;;  %v2126_v47 = vsub.f32 %v1233_v41, %v1233_v41  ;;  %v2128_v48 = vsub.f32 %v1234_v42, %v1234_v42  ;;  %v1235_v49 = vsel %vm52_vm9, 1.0, %v1844_v20 }
  0x13   :  { %1732 = vmatprep.subr.bf16.mxu0 %v1842_v2  ;;  %1660 = vmatprep.subr.bf16.mxu1 %v1842_v2  ;;  %v1236_v50 = vsel %vm53_vm10, 1.0, %v1844_v20  ;;  %v202_v51 = vand.u32 4294901760, %v2094_v39  ;;  %v209_v52 = vand.u32 4294901760, %v2096_v40  ;;  %v2148_v53 = vpack.c.bf16 %v197_v45, %v190_v44 }
  0x14   :  { %1548 = vmatprep.mubr.msk.f32.mxu0 %vm1845_vm7, %v1844_v20  ;;  %1443 = vmatprep.mubr.msk.f32.mxu1 %vm1845_vm7, %v1844_v20  ;;  %v2154_v57 = vsub.f32 %v1235_v49, %v1235_v49  ;;  %v2156_v58 = vsub.f32 %v1236_v50, %v1236_v50  ;;  %v1237_v59 = vsel %vm54_vm12, 1.0, %v1844_v20  ;;  %vm2449_vm9 = vcmp.le.s32.totalorder %v1983_v18, %v1874_v4 }
  0x15   :  { %v2150_v54 = vpack.c.bf16 %v209_v52, %v202_v51  ;;  %v203_v55 = vsub.f32 %v2094_v39, %v202_v51  ;;  %v210_v56 = vsub.f32 %v2096_v40, %v209_v52  ;;  %v1238_v60 = vsel %vm2449_vm9, 1.0, %v1844_v20 }
  0x16   :  { %1734 = vmatpush3.bf16.msk.msra.mxu0 %vm1969_vm11, %v1843_v11  ;;  %1662 = vmatpush3.bf16.msk.msra.mxu1 %vm1969_vm11, %v1843_v11  ;;  %v216_v63 = vand.u32 4294901760, %v2126_v47  ;;  %v223_v1 = vand.u32 4294901760, %v2128_v48  ;;  %v2174_v9 = vsub.f32 %v1237_v59, %v1237_v59  ;;  %v2176_v14 = vsub.f32 %v1238_v60, %v1238_v60 }
  0x17   :  { %1735 = vmatprep.subr.bf16.mxu0 %v1842_v2  ;;  %1663 = vmatprep.subr.bf16.mxu1 %v1842_v2  ;;  %v204_v61 = vand.u32 4294901760, %v203_v55  ;;  %v211_v62 = vand.u32 4294901760, %v210_v56  ;;  %vm2450_vm10 = vcmp.le.s32.totalorder %v2015_v23, %v1874_v4  ;;  %vm2451_vm12 = vcmp.le.s32.totalorder %v2018_v24, %v1874_v4 }
  0x18   :  { %v2170_v6 = vpack.c.bf16 %v223_v1, %v216_v63  ;;  %v217_v7 = vsub.f32 %v2126_v47, %v216_v63  ;;  %v224_v8 = vsub.f32 %v2128_v48, %v223_v1  ;;  %v1239_v15 = vsel %vm2450_vm10, 1.0, %v1844_v20 }
  0x19   :  { %v2168_v5 = vpack.c.bf16 %v211_v62, %v204_v61  ;;  %v1240_v17 = vsel %vm2451_vm12, 1.0, %v1844_v20  ;;  %v230_v22 = vand.u32 4294901760, %v2154_v57  ;;  %v237_v30 = vand.u32 4294901760, %v2156_v58 }
  0x1a   :  { %1737 = vmatpush3.bf16.msk.msra.mxu0 %vm1997_vm14, %v1843_v11  ;;  %1665 = vmatpush3.bf16.msk.msra.mxu1 %vm1997_vm14, %v1843_v11  ;;  %v218_v18 = vand.u32 4294901760, %v217_v7  ;;  %v225_v21 = vand.u32 4294901760, %v224_v8  ;;  %v2194_v37 = vsub.f32 %v1239_v15, %v1239_v15  ;;  %v2196_v38 = vsub.f32 %v1240_v17, %v1240_v17 }
  0x1b   :  { %1738 = vmatprep.subr.bf16.mxu0 %v1842_v2  ;;  %1666 = vmatprep.subr.bf16.mxu1 %v1842_v2  ;;  %v2190_v33 = vpack.c.bf16 %v237_v30, %v230_v22  ;;  %v231_v34 = vsub.f32 %v2154_v57, %v230_v22  ;;  %v238_v23 = vsub.f32 %v2156_v58, %v237_v30  ;;  %v1241_v24 = vsel %vm58_vm0, 1.0, %v1844_v20 }
  0x1c   :  { %v2188_v31 = vpack.c.bf16 %v225_v21, %v218_v18  ;;  %v1242_v41 = vsel %vm59_vm15, 1.0, %v1844_v20  ;;  %v244_v45 = vand.u32 4294901760, %v2174_v9  ;;  %v251_v49 = vand.u32 4294901760, %v2176_v14 }
  0x1d   :  { %v232_v42 = vand.u32 4294901760, %v231_v34  ;;  %v239_v44 = vand.u32 4294901760, %v238_v23  ;;  %v2214_v55 = vsub.f32 %v1241_v24, %v1241_v24  ;;  %v2216_v56 = vsub.f32 %v1242_v41, %v1242_v41 }
  0x1e   :  { %1740 = vmatpush3.bf16.msk.msra.mxu0 %vm2036_vm1, %v1843_v11  ;;  %1668 = vmatpush3.bf16.msk.msra.mxu1 %vm2036_vm1, %v1843_v11  ;;  %v2210_v51 = vpack.c.bf16 %v251_v49, %v244_v45  ;;  %v245_v52 = vsub.f32 %v2174_v9, %v244_v45  ;;  %v252_v28 = vsub.f32 %v2176_v14, %v251_v49  ;;  %v1243_v29 = vsel %vm60_vm2, 1.0, %v1844_v20 }
  0x1f   :  { %1741 = vmatprep.subr.bf16.mxu0 %v1842_v2  ;;  %1669 = vmatprep.subr.bf16.mxu1 %v1842_v2  ;;  %v2208_v50 = vpack.c.bf16 %v239_v44, %v232_v42  ;;  %v1244_v59 = vsel %vm61_vm3, 1.0, %v1844_v20  ;;  %v258_v62 = vand.u32 4294901760, %v2194_v37  ;;  %v265_v63 = vand.u32 4294901760, %v2196_v38 }
  0x20   :  { %v246_v60 = vand.u32 4294901760, %v245_v52  ;;  %v253_v61 = vand.u32 4294901760, %v252_v28  ;;  %v2234_v15 = vsub.f32 %v1243_v29, %v1243_v29  ;;  %v2236_v17 = vsub.f32 %v1244_v59, %v1244_v59 }
  0x21   :  { %v2230_v7 = vpack.c.bf16 %v265_v63, %v258_v62  ;;  %v259_v8 = vsub.f32 %v2194_v37, %v258_v62  ;;  %v266_v35 = vsub.f32 %v2196_v38, %v265_v63  ;;  %v272_v21 = vand.u32 4294901760, %v2214_v55 }
  0x22   :  { %1743 = vmatpush3.bf16.msk.msra.mxu0 %vm2066_vm13, %v1843_v11  ;;  %1671 = vmatpush3.bf16.msk.msra.mxu1 %vm2066_vm13, %v1843_v11  ;;  %v2228_v1 = vpack.c.bf16 %v253_v61, %v246_v60  ;;  %v279_v22 = vand.u32 4294901760, %v2216_v56  ;;  %v286_v44 = vand.u32 4294901760, %v2234_v15  ;;  %v293_v45 = vand.u32 4294901760, %v2236_v17 }
  0x23   :  { %1744 = vmatprep.subr.bf16.mxu0 %v1842_v2  ;;  %1672 = vmatprep.subr.bf16.mxu1 %v1842_v2  ;;  %v260_v36 = vand.u32 4294901760, %v259_v8  ;;  %v267_v18 = vand.u32 4294901760, %v266_v35  ;;  %v273_v23 = vsub.f32 %v2214_v55, %v272_v21  ;;  %v1700_v62 = vpack.c.bf16 %v2028_v26, %v2026_v25 }
  0x24   :  { %v2242_v34 = vpack.c.bf16 %v279_v22, %v272_v21  ;;  %v280_v24 = vsub.f32 %v2216_v56, %v279_v22  ;;  %v2250_v52 = vpack.c.bf16 %v293_v45, %v286_v44  ;;  %v287_v28 = vsub.f32 %v2234_v15, %v286_v44 }
  0x25   :  { %v2240_v30 = vpack.c.bf16 %v267_v18, %v260_v36  ;;  %v274_v41 = vand.u32 4294901760, %v273_v23  ;;  %v294_v29 = vsub.f32 %v2236_v17, %v293_v45  ;;  %v1703_v63 = vpack.c.bf16 %v2096_v40, %v2094_v39 }
  0x26   :  { %1746 = vmatpush3.bf16.msk.msra.mxu0 %vm2118_vm6, %v1843_v11  ;;  %1674 = vmatpush3.bf16.msk.msra.mxu1 %vm2118_vm6, %v1843_v11  ;;  %v281_v42 = vand.u32 4294901760, %v280_v24  ;;  %v288_v59 = vand.u32 4294901760, %v287_v28  ;;  %v1706_v8 = vpack.c.bf16 %v2128_v48, %v2126_v47  ;;  %v1709_v21 = vpack.c.bf16 %v2156_v58, %v2154_v57 }
  0x27   :  { %1747 = vmatprep.subr.bf16.mxu0 %v1842_v2  ;;  %1675 = vmatprep.subr.bf16.mxu1 %v1842_v2  ;;  %v295_v60 = vand.u32 4294901760, %v294_v29  ;;  %v1712_v24 = vpack.c.bf16 %v2176_v14, %v2174_v9  ;;  %v1715_v44 = vpack.c.bf16 %v2196_v38, %v2194_v37  ;;  %v1718_v45 = vpack.c.bf16 %v2216_v56, %v2214_v55 }
  0x28   :  { %v2248_v49 = vpack.c.bf16 %v281_v42, %v274_v41  ;;  %v1721_v28 = vpack.c.bf16 %v2236_v17, %v2234_v15  ;;  %v1847_v47 = vmov 0  }
  0x29   :  { %v1697_v61 = vpack.c.bf16 %v295_v60, %v288_v59  ;;  %1824 = vset.pattern.permute.xlu1 %v1847_v47  ;;  %1825 = vset.pattern.permute.xlu0 %v1847_v47 }
  0x8f   :  { %v15_v35 = vpop.xlane.xlu0 %14 }
  0x90   :  { %v16_v36 = vrot.slane %v15_v35, 4 }
  0x92   :  { %v17_v18 = vmax.f32 %v15_v35, %v16_v36 }
  0x94   :  { %v18_v22 = vrot.slane %v17_v18, 2 }
  0x96   :  { %v19_v23 = vmax.f32 %v17_v18, %v18_v22 }
  0x98   :  { %v20_v41 = vrot.slane %v19_v23, 1 }
  0x9a   :  { %v21_v42 = vmax.f32 %v19_v23, %v20_v41 }
  0x9c   :  { %1813 = vpush %v21_v42 }
  0xcd   :  { %s1814_s0 = spop %1813 }
  0xce   :  { %v23_v29 = vstv %s1814_s0 }
  0xcf   :  { %v2271_v59 = vsub.f32 %v1867_v0, %v23_v29 }
  0xd1   :  { %v25_v60 = vmul.f32 1.442695, %v2271_v59 }
  0xd3   :  { %1826 = vpow2.f32 %v25_v60 }
  0xdd   :  { %v1827_v35 = vpop.eup %1826 }
  0xde   :  { %v2274_v36 = vand.u32 4294901760, %v1827_v35 }
  0xe0   :  { %v2277_v18 = vsub.f32 %v1827_v35, %v2274_v36 }
  0xe2   :  { %v177_v22 = vand.u32 4294901760, %v2277_v18 }
  0xe4   :  { %1549 = vmatmul.mubr.f32.vlgmr.msra.gmra.mrb[0].mxu0 %v177_v22  ;;  %v178_v23 = vsub.f32 %v2277_v18, %v177_v22 }
  0xe5   :  { %1749 = vmatpush3.bf16.msra.mxu0 %v2110_v43  ;;  %1583 = vmatprep.mubr.msk.f32.mxu0 %vm1845_vm7, %v1844_v20 }
  0xe6   :  { %1750 = vmatprep.subr.bf16.mxu0 %v1842_v2  ;;  %v179_v0 = vand.u32 4294901760, %v178_v23 }
  0xe8   :  { %1444 = vmatmul.mubr.f32.vlgmr.msra.gmra.mrb[0].mxu1 %v179_v0 }
  0xe9   :  { %1677 = vmatpush3.bf16.msra.mxu1 %v2148_v53  ;;  %1752 = vmatpush3.bf16.msra.mxu0 %v2150_v54 }
  0xea   :  { %1678 = vmatprep.subr.bf16.mxu1 %v1842_v2  ;;  %1753 = vmatprep.subr.bf16.mxu0 %v1842_v2 }
  0xeb   :  { %1478 = vmatprep.mubr.msk.f32.mxu1 %vm1845_vm7, %v1844_v20 }
  0xed   :  { %1680 = vmatpush3.bf16.msra.mxu1 %v2168_v5  ;;  %1755 = vmatpush3.bf16.msra.mxu0 %v2170_v6 }
  0xee   :  { %1681 = vmatprep.subr.bf16.mxu1 %v1842_v2  ;;  %1756 = vmatprep.subr.bf16.mxu0 %v1842_v2 }
  0xf1   :  { %1683 = vmatpush3.bf16.msra.mxu1 %v2188_v31  ;;  %1758 = vmatpush3.bf16.msra.mxu0 %v2190_v33  ;;  %v13_v33 = vld [vmem:[%s2428_s1] sm:$0xff] }
  0xf2   :  { %1684 = vmatprep.subr.bf16.mxu1 %v1842_v2  ;;  %1759 = vmatprep.subr.bf16.mxu0 %v1842_v2 }
  0xf5   :  { %1686 = vmatpush3.bf16.msra.mxu1 %v2208_v50  ;;  %1761 = vmatpush3.bf16.msra.mxu0 %v2210_v51 }
  0xf6   :  { %1687 = vmatprep.subr.bf16.mxu1 %v1842_v2  ;;  %1762 = vmatprep.subr.bf16.mxu0 %v1842_v2 }
  0xf9   :  { %1689 = vmatpush3.bf16.msra.mxu1 %v2228_v1  ;;  %1764 = vmatpush3.bf16.msra.mxu0 %v2230_v7 }
  0xfa   :  { %1690 = vmatprep.subr.bf16.mxu1 %v1842_v2  ;;  %1765 = vmatprep.subr.bf16.mxu0 %v1842_v2 }
  0xfd   :  { %1692 = vmatpush3.bf16.msra.mxu1 %v2240_v30  ;;  %1767 = vmatpush3.bf16.msra.mxu0 %v2242_v34 }
  0xfe   :  { %1693 = vmatprep.subr.bf16.mxu1 %v1842_v2  ;;  %1768 = vmatprep.subr.bf16.mxu0 %v1842_v2 }
 0x101   :  { %1695 = vmatpush3.bf16.msra.mxu1 %v2248_v49  ;;  %1770 = vmatpush3.bf16.msra.mxu0 %v2250_v52 }
 0x102   :  { %1696 = vmatprep.subr.bf16.mxu1 %v1842_v2  ;;  %1771 = vmatprep.subr.bf16.mxu0 %v1842_v2 }
 0x104   :  { %1584 = vmatmul.mubr.f32.vlgmr.msra.gmra.mrb[0].mxu0 %v2274_v36 }
 0x105   :  { %1698 = vmatpush3.bf16.msra.mxu1 %v1697_v61  ;;  %1773 = vmatpush3.bf16.msk.msra.mxu0 %vm1901_vm4, %v1843_v11  ;;  %vm735_vm4 = vcmp.lt.s32.totalorder %v1874_v4, %v1872_v3 }
 0x106   :  { %1699 = vmatprep.subr.bf16.mxu1 %v1842_v2  ;;  %1774 = vmatprep.subr.bf16.mxu0 %v1842_v2  ;;  %v1293_v16 = vsel %vm735_vm4, 1.0, %v1844_v20 }
 0x107   :  { %1618 = vmatprep.mubr.msk.f32.mxu0 %vm1845_vm7, %v1844_v20 }
 0x108   :  { %1479 = vmatmul.mubr.f32.vlgmr.msra.gmra.mrb[0].mxu1 %v2274_v36 }
 0x109   :  { %1701 = vmatpush3.bf16.msra.mxu1 %v1700_v62  ;;  %1776 = vmatpush3.bf16.msk.msra.mxu0 %vm1918_vm5, %v1843_v11  ;;  %vm742_vm5 = vcmask 64512  }
 0x10a   :  { %1702 = vmatprep.subr.bf16.mxu1 %v1842_v2  ;;  %1777 = vmatprep.subr.bf16.mxu0 %v1842_v2  ;;  %v744_v19 = vsel %vm742_vm5, %v1293_v16, 0 }
 0x10b   :  { %1513 = vmatprep.mubr.msk.f32.mxu1 %vm1845_vm7, %v1844_v20  ;;  %v813_v25 = vsub.f32 %v744_v19, %v744_v19 }
 0x10d   :  { %1704 = vmatpush3.bf16.msra.mxu1 %v1703_v63  ;;  %1779 = vmatpush3.bf16.msk.msra.mxu0 %vm1940_vm8, %v1843_v11  ;;  %v814_v26 = vand.u32 4294901760, %v813_v25 }
 0x10e   :  { %1705 = vmatprep.subr.bf16.mxu1 %v1842_v2  ;;  %1780 = vmatprep.subr.bf16.mxu0 %v1842_v2 }
 0x10f   :  { %v815_v27 = vsub.f32 %v813_v25, %v814_v26 }
 0x111   :  { %1707 = vmatpush3.bf16.msra.mxu1 %v1706_v8  ;;  %1782 = vmatpush3.bf16.msk.msra.mxu0 %vm1969_vm11, %v1843_v11  ;;  %v816_v39 = vand.u32 4294901760, %v815_v27 }
 0x112   :  { %1708 = vmatprep.subr.bf16.mxu1 %v1842_v2  ;;  %1783 = vmatprep.subr.bf16.mxu0 %v1842_v2 }
 0x115   :  { %1710 = vmatpush3.bf16.msra.mxu1 %v1709_v21  ;;  %1785 = vmatpush3.bf16.msk.msra.mxu0 %vm1997_vm14, %v1843_v11 }
 0x116   :  { %1711 = vmatprep.subr.bf16.mxu1 %v1842_v2  ;;  %1786 = vmatprep.subr.bf16.mxu0 %v1842_v2 }
 0x119   :  { %1713 = vmatpush3.bf16.msra.mxu1 %v1712_v24  ;;  %1788 = vmatpush3.bf16.msk.msra.mxu0 %vm2036_vm1, %v1843_v11 }
 0x11a   :  { %1714 = vmatprep.subr.bf16.mxu1 %v1842_v2  ;;  %1789 = vmatprep.subr.bf16.mxu0 %v1842_v2 }
 0x11d   :  { %1716 = vmatpush3.bf16.msra.mxu1 %v1715_v44  ;;  %1791 = vmatpush3.bf16.msk.msra.mxu0 %vm2066_vm13, %v1843_v11 }
 0x11e   :  { %1717 = vmatprep.subr.bf16.mxu1 %v1842_v2  ;;  %1792 = vmatprep.subr.bf16.mxu0 %v1842_v2 }
 0x121   :  { %1719 = vmatpush3.bf16.msra.mxu1 %v1718_v45  ;;  %1794 = vmatpush3.bf16.msk.msra.mxu0 %vm2118_vm6, %v1843_v11 }
 0x122   :  { %1720 = vmatprep.subr.bf16.mxu1 %v1842_v2  ;;  %1621 = vmatprep.subr.mxu0 %v1844_v20 }
 0x124   :  { %1619 = vmatmul.mubr.f32.vlgmr.msra.gmra.mrb[0].mxu0 %v2274_v36 }
 0x125   :  { %1722 = vmatpush3.bf16.msra.mxu1 %v1721_v28  ;;  %1623 = vmatprep.mubr.msk.f32.mxu0 %vm1845_vm7, %v1844_v20 }
 0x126   :  { %1636 = vmatprep.subr.mxu1 %v1844_v20 }
 0x128   :  { %1514 = vmatmul.mubr.f32.vlgmr.msra.gmra.mrb[0].mxu1 %v2277_v18 }
 0x129   :  { %1638 = vmatprep.mubr.msk.f32.mxu1 %vm1845_vm7, %v1844_v20 }
 0x1f7   :  { %v731_v10 = vpop.f32.mrb[0].mxu0 }
 0x1f8   :  { %v1620_v2 = vpop.f32.mrb[1].mxu0 }
 0x1fb   :  { %v436_v11 = vpop.f32.mrb[0].mxu1 }
 0x1fc   :  { %v1795_v12 = vadd.f32 %v731_v10, %v436_v11  ;;  %v1515_v13 = vpop.f32.mrb[1].mxu1 }
 0x1fe   :  { %739 = vrot.lane.b32.xlu0 %v1795_v12, %s1846_s11 }
 0x270   :  { %v740_v32 = vpop.permute.xlu0 %739 }
 0x271   :  { %v747_v40 = vand.u32 4294901760, %v740_v32 }
 0x273   :  { %v824_v43 = vsub.f32 %v740_v32, %v747_v40  ;;  %1622 = vmatpush3.msra.mxu0 %v747_v40  ;;  %1637 = vmatpush3.msra.mxu1 %v747_v40 }
 0x274   :  { %1624 = vmatmul.mubr.f32.vlgmr.msra.gmra.mrb[2].mxu0 %v816_v39  ;;  %1639 = vmatmul.mubr.f32.vlgmr.msra.gmra.mrb[2].mxu1 %v814_v26 }
 0x275   :  { %v825_v46 = vand.u32 4294901760, %v824_v43  ;;  %1641 = vmatprep.subr.mxu1 %v1844_v20  ;;  %1626 = vmatprep.subr.mxu0 %v1844_v20 }
 0x276   :  { %1628 = vmatprep.mubr.msk.f32.mxu0 %vm1845_vm7, %v1844_v20  ;;  %1643 = vmatprep.mubr.msk.f32.mxu1 %vm1845_vm7, %v1844_v20 }
 0x277   :  { %v826_v3 = vsub.f32 %v824_v43, %v825_v46  ;;  %1642 = vmatpush3.msra.mxu1 %v825_v46 }
 0x278   :  { %1646 = vmatprep.subr.mxu1 %v1844_v20 }
 0x279   :  { %v827_v4 = vand.u32 4294901760, %v826_v3 }
 0x27b   :  { %1627 = vmatpush3.msra.mxu0 %v827_v4 }
 0x27c   :  { %1629 = vmatmul.mubr.msk.f32.vlgmr.msra.gmra.mrb[2].mxu0 %vm742_vm5, %v1293_v16  ;;  %1631 = vmatprep.subr.mxu0 %v1844_v20 }
 0x27d   :  { %1644 = vmatmul.mubr.msk.f32.vlgmr.msra.gmra.mrb[2].mxu1 %vm742_vm5, %v1293_v16  ;;  %1632 = vmatpush3.msra.mxu0 %v824_v43 }
 0x27e   :  { %1647 = vmatpush3.msra.mxu1 %v747_v40  ;;  %1633 = vmatprep.mubr.msk.f32.mxu0 %vm1845_vm7, %v1844_v20 }
 0x27f   :  { %1648 = vmatprep.mubr.msk.f32.mxu1 %vm1845_vm7, %v1844_v20 }
 0x284   :  { %1634 = vmatmul.mubr.f32.vlgmr.msra.gmra.mrb[2].mxu0 %v813_v25 }
 0x285   :  { %1649 = vmatmul.mubr.msk.f32.vlgmr.msra.gmra.mrb[2].mxu1 %vm742_vm5, %v1293_v16 }
 0x357   :  { %v968_v48 = vpop.f32.mrb[2].mxu0 }
 0x358   :  { %v1188_v53 = vpop.f32.mrb[2].mxu1  ;;  %v1635_v54 = vpop.f32.mrb[3].mxu0 }
 0x359   :  { %v1796_v57 = vadd.f32 %v1188_v53, %v968_v48  ;;  %v1650_v58 = vpop.f32.mrb[3].mxu1 }
 0x35b   :  { %1194 = vperm.xlu1 %1824, %v1796_v57  }
 0x3da   :  { %v1195_v5 = vpop.permute.xlu1 %1194 }
 0x3db   :  { %v1197_v6 = vadd.f32 %v1795_v12, %v1195_v5 }
 0x3dd   :  { %v1198_v9 = vadd.f32 1e-15, %v1197_v6 }
 0x3df   :  { %1828 = vlog2.f32 %v1198_v9 }
 0x3e9   :  { %v1829_v14 = vpop.eup %1828 }
 0x3ea   :  { %v1200_v31 = vmul.f32 0.6931472, %v1829_v14 }
 0x3ec   :  { %v1201_v20 = vsub.f32 %v2271_v59, %v1200_v31 }
 0x3ee   :  { %v1202_v37 = vsub.f32 0.0, %v1201_v20 }
 0x3f0   :  { %v1203_v38 = vmul.f32 %v1202_v37, %v13_v33 }
 0x3f2   :  { %1204 = vadd.xlane.f32.xlu1 %v1203_v38 }
 0x47f   :  { %v1205_v50 = vpop.xlane.xlu1 %1204 }
 0x480   :  { %v1206_v51 = vrot.slane %v1205_v50, 4 }
 0x482   :  { %v1207_v55 = vadd.f32 %v1206_v51, %v1205_v50 }
 0x484   :  { %v1208_v56 = vrot.slane %v1207_v55, 2 }
 0x486   :  { %v1209_v1 = vadd.f32 %v1208_v56, %v1207_v55 }
 0x488   :  { %v1210_v7 = vrot.slane %v1209_v1, 1 }
 0x48a   :  { %v1211_v15 = vadd.f32 %v1210_v7, %v1209_v1 }
 0x48c   :  { %1815 = vpush %v1211_v15 }
 0x4bd   :  { %s1816_s14 = spop %1815 }
 0x4be   :  { %s1213_s15 = smul.f32 0.125, %s1816_s14 }
 0x4c0   :  { %1215 = sst [smem:[#allocation2]] %s1213_s15 }
 0x4c1   :  { %1839 = shalt.err (!%p1836_p2)
}
 0x4c2   :  { %s1848_s22 = smov [#allocation2]  }
 0x4c3   :  { %1223 = dma.smem_to_hbm %s1848_s22, 16, %s2429_s2, [#allocation3]  }
 0x4c4   :  { %1840 = dma.done.wait [#allocation3], 16  }
 0x4c5   :  { %1841 = vsyncadd [#allocation3], 4294967280 }
 0x4c6   :  { %1227 = sfence }
 0x4c7   :  { %1228 = vsyncpa [#allocation3], 1 }

</bundles_post_ra>
